<compile_context>
chip_gen: v6e
topology: v6e:2x2x1
jax: 0.10.0
libtpu: 0.0.40
codegen_flags: <defaults>
</compile_context>

<pallas_src>
import numpy as np
import jax
import jax.numpy as jnp
from jax import lax
from jax.experimental import pallas as pl
from jax.experimental.pallas import tpu as pltpu

EPS = 1e-5


def _make_bottleneck_kernel(N, H, W, Cin, Cmid, Cout):
    HW = H * W
    inv_m = 1.0 / (N * HW)

    def bn_act(ys, g_ref, b_ref, relu, out_dtype):
        # Fused training-mode BN over the batch of per-image (C, HW) slabs:
        # one stats pass (sum, sum-of-squares accumulated across images), then
        # a single y*scale + shift pass per image, fused with ReLU and with
        # the cast to whatever dtype the next consumer wants.
        s = None
        ss = None
        for y in ys:
            ps = jnp.sum(y, axis=1, keepdims=True)          # (C, 1)
            pss = jnp.sum(y * y, axis=1, keepdims=True)     # (C, 1)
            s = ps if s is None else s + ps
            ss = pss if ss is None else ss + pss
        mean = s * inv_m
        var = ss * inv_m - mean * mean
        scale = g_ref[...] * lax.rsqrt(var + EPS)           # (C, 1)
        shift = b_ref[...] - mean * scale                   # (C, 1)
        outs = []
        for y in ys:
            o = y * scale + shift
            if relu:
                o = jnp.maximum(o, 0.0)
            outs.append(o.astype(out_dtype))
        return outs

    def kernel(x_ref, w1_ref, w2_ref, w3_ref, mask_ref,
               g1_ref, b1_ref, g2_ref, b2_ref, g3_ref, b3_ref, o_ref):
        # Per-tap validity masks, hoisted once: (9, HW) f32.
        masks = mask_ref[...]
        mask_rows = [masks[t:t + 1, :] for t in range(9)]   # each (1, HW)

        # ---- conv1: 1x1 -> (Cmid, Cin) @ (Cin, HW) per image, bf16 ops ----
        y1 = []
        for n in range(N):
            y1.append(jnp.dot(w1_ref[...], x_ref[n].astype(jnp.bfloat16),
                              preferred_element_type=jnp.float32))
        y1 = bn_act(y1, g1_ref, b1_ref, relu=True, out_dtype=jnp.float32)

        # ---- conv2: 3x3 SAME as ONE im2col matmul per image, K = 9*Cmid ----
        # Each tap is a lane rotate of the flattened (C, HW) image; the
        # circular wrap (and same-image wrong-row reads) only hit positions
        # whose tap is out-of-image, which the precomputed masks zero.
        y2 = []
        for n in range(N):
            taps = []
            for kh in range(3):
                for kw in range(3):
                    t = kh * 3 + kw
                    s = (kh - 1) * W + (kw - 1)
                    if s == 0:
                        taps.append(y1[n])                  # center tap, mask=1
                    else:
                        rolled = pltpu.roll(y1[n], shift=(-s) % HW, axis=1)
                        taps.append(rolled * mask_rows[t])
            # (9*Cmid, HW); single bf16 cast feeding one K=72 MXU pass.
            # TODO(synk): at real ResNet sizes build p_all directly in bf16
            # (per-tap cast) to halve the im2col footprint for v7x's 64 MiB VMEM.
            p_all = jnp.concatenate(taps, axis=0)
            y2.append(jnp.dot(w2_ref[...], p_all.astype(jnp.bfloat16),
                              preferred_element_type=jnp.float32))
        # Next consumer is a bf16 matmul -> fuse the cast into BN+ReLU.
        y2 = bn_act(y2, g2_ref, b2_ref, relu=True, out_dtype=jnp.bfloat16)

        # ---- conv3: 1x1 expansion -> (Cout, Cmid) @ (Cmid, HW) ----
        y3 = []
        for n in range(N):
            y3.append(jnp.dot(w3_ref[...], y2[n],
                              preferred_element_type=jnp.float32))
        y3 = bn_act(y3, g3_ref, b3_ref, relu=False, out_dtype=jnp.float32)

        # ---- residual add (re-read x_ref; don't keep f32 x live) + ReLU ----
        for n in range(N):
            o_ref[n] = jnp.maximum(y3[n] + x_ref[n], 0.0).astype(o_ref.dtype)

    return kernel


@jax.jit
def bottleneck_block_nchw(x_nchw, params):
    """PyTorch-convention entry point: NCHW in, NCHW out (float32)."""
    w1, w2, w3, g1, b1, g2, b2, g3, b3 = params   # conv weights in OIHW
    N, Cin, H, W = x_nchw.shape
    Cmid = w1.shape[0]
    Cout = w3.shape[0]
    assert Cout == Cin, "identity add needs in_channels == 4*intermediate"
    HW = H * W

    # (N, C, H*W): a *free* reshape of NCHW — no transpose, no extra HBM pass.
    x3 = x_nchw.reshape(N, Cin, HW).astype(jnp.float32)

    # Weights in matmul layouts, bf16 for the MXU (accumulation stays f32).
    w1_k = w1.reshape(Cmid, Cin).astype(jnp.bfloat16)
    w2_k = jnp.transpose(w2, (0, 2, 3, 1)).reshape(Cmid, 9 * Cmid)
    w2_k = w2_k.astype(jnp.bfloat16)
    w3_k = w3.reshape(Cout, Cmid).astype(jnp.bfloat16)

    # BN affine params as (C, 1) columns (broadcast along the lane axis).
    g1c = g1.reshape(Cmid, 1).astype(jnp.float32)
    b1c = b1.reshape(Cmid, 1).astype(jnp.float32)
    g2c = g2.reshape(Cmid, 1).astype(jnp.float32)
    b2c = b2.reshape(Cmid, 1).astype(jnp.float32)
    g3c = g3.reshape(Cout, 1).astype(jnp.float32)
    b3c = b3.reshape(Cout, 1).astype(jnp.float32)

    # Per-tap validity masks for the 3x3 SAME conv: host-side numpy constant
    # (no traced device pass), batch independent, shape (9, H*W).
    # tap_mask[t, h*W + w] == 1 iff (h+kh-1, w+kw-1) is in-image, t = kh*3+kw.
    pos = np.arange(HW)
    hh = pos // W
    ww = pos % W
    rows = []
    for kh in range(3):
        for kw in range(3):
            dh, dw = kh - 1, kw - 1
            rows.append(((hh + dh >= 0) & (hh + dh < H) &
                         (ww + dw >= 0) & (ww + dw < W)).astype(np.float32))
    tap_mask = jnp.asarray(np.stack(rows, axis=0))            # (9, HW) f32

    kernel = _make_bottleneck_kernel(N, H, W, Cin, Cmid, Cout)
    vmem = pl.BlockSpec(memory_space=pltpu.MemorySpace.VMEM)

    flops = 2 * N * HW * (Cin * Cmid + 9 * Cmid * Cmid + Cmid * Cout)
    bytes_accessed = (4 * (x3.size + N * Cout * HW + tap_mask.size)
                      + 2 * (w1_k.size + w2_k.size + w3_k.size)
                      + 4 * 2 * (Cmid + Cmid + Cout))

    # TODO(synk): for full ResNet shapes, tile over an N/H grid with a
    # two-pass BN (global stats pass, then normalize pass), mark the spatial
    # grid axis "parallel" so v7x's two TensorCores split the work, and size
    # the M tile for a 64 MiB VMEM budget; per-tile BN stats would silently
    # change the batch-norm semantics, so it is not done at this toy shape.
    out3 = pl.pallas_call(
        kernel,
        out_shape=jax.ShapeDtypeStruct((N, Cout, HW), jnp.float32),
        in_specs=[vmem] * 11,
        out_specs=vmem,
        compiler_params=pltpu.CompilerParams(
            vmem_limit_bytes=32 * 1024 * 1024),
        cost_estimate=pl.CostEstimate(
            flops=flops,
            transcendentals=2 * Cmid + Cout,
            bytes_accessed=bytes_accessed),
    )(x3, w1_k, w2_k, w3_k, tap_mask,
      g1c, b1c, g2c, b2c, g3c, b3c)

    # Free reshape back to NCHW — output is already channels-first-flattened.
    return out3.reshape(N, Cout, H, W)


# ---------------------------- pure-JAX reference -----------------------------
def _bn_ref(y_nhwc, g, b):
    mean = jnp.mean(y_nhwc, axis=(0, 1, 2), keepdims=True)
    var = jnp.mean((y_nhwc - mean) ** 2, axis=(0, 1, 2), keepdims=True)
    return ((y_nhwc - mean) * lax.rsqrt(var + EPS) * g.reshape(1, 1, 1, -1)
            + b.reshape(1, 1, 1, -1))


def ref_forward_nchw(x_nchw, params):
    w1, w2, w3, g1, b1, g2, b2, g3, b3 = params
    x = jnp.transpose(x_nchw, (0, 2, 3, 1))                   # NHWC
    dn = ("NHWC", "HWIO", "NHWC")
    w1h = jnp.transpose(w1, (2, 3, 1, 0))                     # (1,1,Cin,Cmid)
    w2h = jnp.transpose(w2, (2, 3, 1, 0))                     # (3,3,Cmid,Cmid)
    w3h = jnp.transpose(w3, (2, 3, 1, 0))                     # (1,1,Cmid,Cout)
    y = lax.conv_general_dilated(x, w1h, (1, 1), "VALID", dimension_numbers=dn)
    y = jnp.maximum(_bn_ref(y, g1, b1), 0.0)
    y = lax.conv_general_dilated(y, w2h, (1, 1), "SAME", dimension_numbers=dn)
    y = jnp.maximum(_bn_ref(y, g2, b2), 0.0)
    y = lax.conv_general_dilated(y, w3h, (1, 1), "VALID", dimension_numbers=dn)
    y = _bn_ref(y, g3, b3)
    y = jnp.maximum(y + x, 0.0)
    return jnp.transpose(y, (0, 3, 1, 2))


# --------------------------------- main ---------------------------------------
if __name__ == "__main__":
    # Config consistent with the module: intermediate_channels=8, expansion=4,
    # in_channels = 8*4 = 32, stride=1, identity_downsample=None.
    N, H, W = 2, 16, 16
    Cmid = 8
    Cin = Cout = Cmid * 4

    key = jax.random.PRNGKey(0)
    kx, k1, k2, k3, kg, kb = jax.random.split(key, 6)

    # Input in PyTorch NCHW convention.
    x_nchw = jax.random.normal(kx, (N, Cin, H, W), dtype=jnp.float32)

    # Conv weights in PyTorch OIHW layout, no bias.
    w1 = jax.random.normal(k1, (Cmid, Cin, 1, 1), jnp.float32) * 0.1
    w2 = jax.random.normal(k2, (Cmid, Cmid, 3, 3), jnp.float32) * 0.1
    w3 = jax.random.normal(k3, (Cout, Cmid, 1, 1), jnp.float32) * 0.1

    # Non-trivial BN affine params (exercise the gamma/beta paths).
    gk = jax.random.split(kg, 3)
    bk = jax.random.split(kb, 3)
    g1 = 1.0 + 0.1 * jax.random.normal(gk[0], (Cmid,), jnp.float32)
    g2 = 1.0 + 0.1 * jax.random.normal(gk[1], (Cmid,), jnp.float32)
    g3 = 1.0 + 0.1 * jax.random.normal(gk[2], (Cout,), jnp.float32)
    b1 = 0.1 * jax.random.normal(bk[0], (Cmid,), jnp.float32)
    b2 = 0.1 * jax.random.normal(bk[1], (Cmid,), jnp.float32)
    b3 = 0.1 * jax.random.normal(bk[2], (Cout,), jnp.float32)

    params = (w1, w2, w3, g1, b1, g2, b2, g3, b3)

    out = jax.block_until_ready(bottleneck_block_nchw(x_nchw, params))
    assert out.shape == (N, Cout, H, W)
    assert out.dtype == jnp.float32

    ref = jax.block_until_ready(ref_forward_nchw(x_nchw, params))
    err = float(jnp.max(jnp.abs(out - ref)))
    # bf16 MXU operands (f32 accumulation) give ~1e-2 worst-case abs error on
    # these unit-variance activations.
    assert err < 1e-1, f"mismatch vs reference, max abs err = {err}"

    print("KERNEL_OK")
</pallas_src>

<mosaic_0001>
module attributes {stable_mosaic.version = 11 : i64} {
  func.func @kernel(%arg0: memref<2x32x256xf32, #tpu.memory_space<vmem>>, %arg1: memref<8x32xbf16, #tpu.memory_space<vmem>>, %arg2: memref<8x72xbf16, #tpu.memory_space<vmem>>, %arg3: memref<32x8xbf16, #tpu.memory_space<vmem>>, %arg4: memref<9x256xf32, #tpu.memory_space<vmem>>, %arg5: memref<8x1xf32, #tpu.memory_space<vmem>>, %arg6: memref<8x1xf32, #tpu.memory_space<vmem>>, %arg7: memref<8x1xf32, #tpu.memory_space<vmem>>, %arg8: memref<8x1xf32, #tpu.memory_space<vmem>>, %arg9: memref<32x1xf32, #tpu.memory_space<vmem>>, %arg10: memref<32x1xf32, #tpu.memory_space<vmem>>, %arg11: memref<2x32x256xf32, #tpu.memory_space<vmem>>) attributes {dimension_semantics = [], scalar_prefetch = 0 : i64, scratch_operands = 0 : i64, tpu.core_type = #tpu.core_type<tc>} {
    %c0 = arith.constant 0 : index
    %c0_0 = arith.constant 0 : index
    %0 = vector.load %arg4[%c0, %c0_0] : memref<9x256xf32, #tpu.memory_space<vmem>>, vector<9x256xf32>
    %1 = vector.extract_strided_slice %0 {offsets = [0, 0], sizes = [1, 256], strides = [1, 1]} : vector<9x256xf32> to vector<1x256xf32>
    %2 = vector.extract_strided_slice %0 {offsets = [1, 0], sizes = [1, 256], strides = [1, 1]} : vector<9x256xf32> to vector<1x256xf32>
    %3 = vector.extract_strided_slice %0 {offsets = [2, 0], sizes = [1, 256], strides = [1, 1]} : vector<9x256xf32> to vector<1x256xf32>
    %4 = vector.extract_strided_slice %0 {offsets = [3, 0], sizes = [1, 256], strides = [1, 1]} : vector<9x256xf32> to vector<1x256xf32>
    %5 = vector.extract_strided_slice %0 {offsets = [5, 0], sizes = [1, 256], strides = [1, 1]} : vector<9x256xf32> to vector<1x256xf32>
    %6 = vector.extract_strided_slice %0 {offsets = [6, 0], sizes = [1, 256], strides = [1, 1]} : vector<9x256xf32> to vector<1x256xf32>
    %7 = vector.extract_strided_slice %0 {offsets = [7, 0], sizes = [1, 256], strides = [1, 1]} : vector<9x256xf32> to vector<1x256xf32>
    %8 = vector.extract_strided_slice %0 {offsets = [8, 0], sizes = [1, 256], strides = [1, 1]} : vector<9x256xf32> to vector<1x256xf32>
    %c0_1 = arith.constant 0 : index
    %c0_2 = arith.constant 0 : index
    %9 = vector.load %arg1[%c0_1, %c0_2] : memref<8x32xbf16, #tpu.memory_space<vmem>>, vector<8x32xbf16>
    %c0_3 = arith.constant 0 : index
    %c0_4 = arith.constant 0 : index
    %c0_5 = arith.constant 0 : index
    %10 = vector.load %arg0[%c0_3, %c0_4, %c0_5] : memref<2x32x256xf32, #tpu.memory_space<vmem>>, vector<1x32x256xf32>
    %11 = vector.shape_cast %10 : vector<1x32x256xf32> to vector<32x256xf32>
    %12 = arith.truncf %11 : vector<32x256xf32> to vector<32x256xbf16>
    %cst = arith.constant dense<0.000000e+00> : vector<8x256xf32>
    %13 = tpu.matmul %9, %12, %cst {dimension_numbers = #tpu.dot_dimension_numbers<[1], [0], [0], [1], [0, 0, 1, 1], [], []>} : vector<8x32xbf16>, vector<32x256xbf16>, vector<8x256xf32> -> vector<8x256xf32>
    %c0_6 = arith.constant 0 : index
    %c0_7 = arith.constant 0 : index
    %14 = vector.load %arg1[%c0_6, %c0_7] : memref<8x32xbf16, #tpu.memory_space<vmem>>, vector<8x32xbf16>
    %c1 = arith.constant 1 : index
    %c0_8 = arith.constant 0 : index
    %c0_9 = arith.constant 0 : index
    %15 = vector.load %arg0[%c1, %c0_8, %c0_9] : memref<2x32x256xf32, #tpu.memory_space<vmem>>, vector<1x32x256xf32>
    %16 = vector.shape_cast %15 : vector<1x32x256xf32> to vector<32x256xf32>
    %17 = arith.truncf %16 : vector<32x256xf32> to vector<32x256xbf16>
    %cst_10 = arith.constant dense<0.000000e+00> : vector<8x256xf32>
    %18 = tpu.matmul %14, %17, %cst_10 {dimension_numbers = #tpu.dot_dimension_numbers<[1], [0], [0], [1], [0, 0, 1, 1], [], []>} : vector<8x32xbf16>, vector<32x256xbf16>, vector<8x256xf32> -> vector<8x256xf32>
    %cst_11 = arith.constant dense<0.000000e+00> : vector<8xf32>
    %19 = vector.multi_reduction <add>, %13, %cst_11 [1] : vector<8x256xf32> to vector<8xf32>
    %20 = vector.shape_cast %19 : vector<8xf32> to vector<8x1xf32>
    %21 = arith.mulf %13, %13 : vector<8x256xf32>
    %cst_12 = arith.constant dense<0.000000e+00> : vector<8xf32>
    %22 = vector.multi_reduction <add>, %21, %cst_12 [1] : vector<8x256xf32> to vector<8xf32>
    %23 = vector.shape_cast %22 : vector<8xf32> to vector<8x1xf32>
    %cst_13 = arith.constant dense<0.000000e+00> : vector<8xf32>
    %24 = vector.multi_reduction <add>, %18, %cst_13 [1] : vector<8x256xf32> to vector<8xf32>
    %25 = vector.shape_cast %24 : vector<8xf32> to vector<8x1xf32>
    %26 = arith.mulf %18, %18 : vector<8x256xf32>
    %cst_14 = arith.constant dense<0.000000e+00> : vector<8xf32>
    %27 = vector.multi_reduction <add>, %26, %cst_14 [1] : vector<8x256xf32> to vector<8xf32>
    %28 = vector.shape_cast %27 : vector<8xf32> to vector<8x1xf32>
    %29 = arith.addf %20, %25 : vector<8x1xf32>
    %30 = arith.addf %23, %28 : vector<8x1xf32>
    %cst_15 = arith.constant 0.001953125 : f32
    %31 = vector.broadcast %cst_15 : f32 to vector<8x1xf32>
    %32 = arith.mulf %29, %31 : vector<8x1xf32>
    %cst_16 = arith.constant 0.001953125 : f32
    %33 = vector.broadcast %cst_16 : f32 to vector<8x1xf32>
    %34 = arith.mulf %30, %33 : vector<8x1xf32>
    %35 = arith.mulf %32, %32 : vector<8x1xf32>
    %36 = arith.subf %34, %35 : vector<8x1xf32>
    %c0_17 = arith.constant 0 : index
    %c0_18 = arith.constant 0 : index
    %37 = vector.load %arg5[%c0_17, %c0_18] : memref<8x1xf32, #tpu.memory_space<vmem>>, vector<8x1xf32>
    %cst_19 = arith.constant 9.99999974E-6 : f32
    %38 = vector.broadcast %cst_19 : f32 to vector<8x1xf32>
    %39 = arith.addf %36, %38 : vector<8x1xf32>
    %40 = math.rsqrt %39 : vector<8x1xf32>
    %41 = arith.mulf %37, %40 : vector<8x1xf32>
    %c0_20 = arith.constant 0 : index
    %c0_21 = arith.constant 0 : index
    %42 = vector.load %arg6[%c0_20, %c0_21] : memref<8x1xf32, #tpu.memory_space<vmem>>, vector<8x1xf32>
    %43 = arith.mulf %32, %41 : vector<8x1xf32>
    %44 = arith.subf %42, %43 : vector<8x1xf32>
    %45 = vector.broadcast %41 : vector<8x1xf32> to vector<8x256xf32>
    %46 = arith.mulf %13, %45 : vector<8x256xf32>
    %47 = vector.broadcast %44 : vector<8x1xf32> to vector<8x256xf32>
    %48 = arith.addf %46, %47 : vector<8x256xf32>
    %cst_22 = arith.constant 0.000000e+00 : f32
    %49 = vector.broadcast %cst_22 : f32 to vector<8x256xf32>
    %50 = arith.maximumf %48, %49 : vector<8x256xf32>
    %51 = vector.broadcast %41 : vector<8x1xf32> to vector<8x256xf32>
    %52 = arith.mulf %18, %51 : vector<8x256xf32>
    %53 = vector.broadcast %44 : vector<8x1xf32> to vector<8x256xf32>
    %54 = arith.addf %52, %53 : vector<8x256xf32>
    %cst_23 = arith.constant 0.000000e+00 : f32
    %55 = vector.broadcast %cst_23 : f32 to vector<8x256xf32>
    %56 = arith.maximumf %54, %55 : vector<8x256xf32>
    %c17_i32 = arith.constant 17 : i32
    %57 = tpu.dynamic_rotate %50 by %c17_i32 dim 1 : vector<8x256xf32>, i32 -> vector<8x256xf32>
    %58 = vector.broadcast %1 : vector<1x256xf32> to vector<8x256xf32>
    %59 = arith.mulf %57, %58 : vector<8x256xf32>
    %c16_i32 = arith.constant 16 : i32
    %60 = tpu.dynamic_rotate %50 by %c16_i32 dim 1 : vector<8x256xf32>, i32 -> vector<8x256xf32>
    %61 = vector.broadcast %2 : vector<1x256xf32> to vector<8x256xf32>
    %62 = arith.mulf %60, %61 : vector<8x256xf32>
    %c15_i32 = arith.constant 15 : i32
    %63 = tpu.dynamic_rotate %50 by %c15_i32 dim 1 : vector<8x256xf32>, i32 -> vector<8x256xf32>
    %64 = vector.broadcast %3 : vector<1x256xf32> to vector<8x256xf32>
    %65 = arith.mulf %63, %64 : vector<8x256xf32>
    %c1_i32 = arith.constant 1 : i32
    %66 = tpu.dynamic_rotate %50 by %c1_i32 dim 1 : vector<8x256xf32>, i32 -> vector<8x256xf32>
    %67 = vector.broadcast %4 : vector<1x256xf32> to vector<8x256xf32>
    %68 = arith.mulf %66, %67 : vector<8x256xf32>
    %c255_i32 = arith.constant 255 : i32
    %69 = tpu.dynamic_rotate %50 by %c255_i32 dim 1 : vector<8x256xf32>, i32 -> vector<8x256xf32>
    %70 = vector.broadcast %5 : vector<1x256xf32> to vector<8x256xf32>
    %71 = arith.mulf %69, %70 : vector<8x256xf32>
    %c241_i32 = arith.constant 241 : i32
    %72 = tpu.dynamic_rotate %50 by %c241_i32 dim 1 : vector<8x256xf32>, i32 -> vector<8x256xf32>
    %73 = vector.broadcast %6 : vector<1x256xf32> to vector<8x256xf32>
    %74 = arith.mulf %72, %73 : vector<8x256xf32>
    %c240_i32 = arith.constant 240 : i32
    %75 = tpu.dynamic_rotate %50 by %c240_i32 dim 1 : vector<8x256xf32>, i32 -> vector<8x256xf32>
    %76 = vector.broadcast %7 : vector<1x256xf32> to vector<8x256xf32>
    %77 = arith.mulf %75, %76 : vector<8x256xf32>
    %c239_i32 = arith.constant 239 : i32
    %78 = tpu.dynamic_rotate %50 by %c239_i32 dim 1 : vector<8x256xf32>, i32 -> vector<8x256xf32>
    %79 = vector.broadcast %8 : vector<1x256xf32> to vector<8x256xf32>
    %80 = arith.mulf %78, %79 : vector<8x256xf32>
    %81 = tpu.concatenate %59, %62, %65, %68, %50, %71, %74, %77, %80 in 0 : vector<8x256xf32>, vector<8x256xf32>, vector<8x256xf32>, vector<8x256xf32>, vector<8x256xf32>, vector<8x256xf32>, vector<8x256xf32>, vector<8x256xf32>, vector<8x256xf32> -> vector<72x256xf32>
    %c0_24 = arith.constant 0 : index
    %c0_25 = arith.constant 0 : index
    %82 = vector.load %arg2[%c0_24, %c0_25] : memref<8x72xbf16, #tpu.memory_space<vmem>>, vector<8x72xbf16>
    %83 = arith.truncf %81 : vector<72x256xf32> to vector<72x256xbf16>
    %cst_26 = arith.constant dense<0.000000e+00> : vector<8x256xf32>
    %84 = tpu.matmul %82, %83, %cst_26 {dimension_numbers = #tpu.dot_dimension_numbers<[1], [0], [0], [1], [0, 0, 1, 1], [], []>} : vector<8x72xbf16>, vector<72x256xbf16>, vector<8x256xf32> -> vector<8x256xf32>
    %c17_i32_27 = arith.constant 17 : i32
    %85 = tpu.dynamic_rotate %56 by %c17_i32_27 dim 1 : vector<8x256xf32>, i32 -> vector<8x256xf32>
    %86 = vector.broadcast %1 : vector<1x256xf32> to vector<8x256xf32>
    %87 = arith.mulf %85, %86 : vector<8x256xf32>
    %c16_i32_28 = arith.constant 16 : i32
    %88 = tpu.dynamic_rotate %56 by %c16_i32_28 dim 1 : vector<8x256xf32>, i32 -> vector<8x256xf32>
    %89 = vector.broadcast %2 : vector<1x256xf32> to vector<8x256xf32>
    %90 = arith.mulf %88, %89 : vector<8x256xf32>
    %c15_i32_29 = arith.constant 15 : i32
    %91 = tpu.dynamic_rotate %56 by %c15_i32_29 dim 1 : vector<8x256xf32>, i32 -> vector<8x256xf32>
    %92 = vector.broadcast %3 : vector<1x256xf32> to vector<8x256xf32>
    %93 = arith.mulf %91, %92 : vector<8x256xf32>
    %c1_i32_30 = arith.constant 1 : i32
    %94 = tpu.dynamic_rotate %56 by %c1_i32_30 dim 1 : vector<8x256xf32>, i32 -> vector<8x256xf32>
    %95 = vector.broadcast %4 : vector<1x256xf32> to vector<8x256xf32>
    %96 = arith.mulf %94, %95 : vector<8x256xf32>
    %c255_i32_31 = arith.constant 255 : i32
    %97 = tpu.dynamic_rotate %56 by %c255_i32_31 dim 1 : vector<8x256xf32>, i32 -> vector<8x256xf32>
    %98 = vector.broadcast %5 : vector<1x256xf32> to vector<8x256xf32>
    %99 = arith.mulf %97, %98 : vector<8x256xf32>
    %c241_i32_32 = arith.constant 241 : i32
    %100 = tpu.dynamic_rotate %56 by %c241_i32_32 dim 1 : vector<8x256xf32>, i32 -> vector<8x256xf32>
    %101 = vector.broadcast %6 : vector<1x256xf32> to vector<8x256xf32>
    %102 = arith.mulf %100, %101 : vector<8x256xf32>
    %c240_i32_33 = arith.constant 240 : i32
    %103 = tpu.dynamic_rotate %56 by %c240_i32_33 dim 1 : vector<8x256xf32>, i32 -> vector<8x256xf32>
    %104 = vector.broadcast %7 : vector<1x256xf32> to vector<8x256xf32>
    %105 = arith.mulf %103, %104 : vector<8x256xf32>
    %c239_i32_34 = arith.constant 239 : i32
    %106 = tpu.dynamic_rotate %56 by %c239_i32_34 dim 1 : vector<8x256xf32>, i32 -> vector<8x256xf32>
    %107 = vector.broadcast %8 : vector<1x256xf32> to vector<8x256xf32>
    %108 = arith.mulf %106, %107 : vector<8x256xf32>
    %109 = tpu.concatenate %87, %90, %93, %96, %56, %99, %102, %105, %108 in 0 : vector<8x256xf32>, vector<8x256xf32>, vector<8x256xf32>, vector<8x256xf32>, vector<8x256xf32>, vector<8x256xf32>, vector<8x256xf32>, vector<8x256xf32>, vector<8x256xf32> -> vector<72x256xf32>
    %c0_35 = arith.constant 0 : index
    %c0_36 = arith.constant 0 : index
    %110 = vector.load %arg2[%c0_35, %c0_36] : memref<8x72xbf16, #tpu.memory_space<vmem>>, vector<8x72xbf16>
    %111 = arith.truncf %109 : vector<72x256xf32> to vector<72x256xbf16>
    %cst_37 = arith.constant dense<0.000000e+00> : vector<8x256xf32>
    %112 = tpu.matmul %110, %111, %cst_37 {dimension_numbers = #tpu.dot_dimension_numbers<[1], [0], [0], [1], [0, 0, 1, 1], [], []>} : vector<8x72xbf16>, vector<72x256xbf16>, vector<8x256xf32> -> vector<8x256xf32>
    %cst_38 = arith.constant dense<0.000000e+00> : vector<8xf32>
    %113 = vector.multi_reduction <add>, %84, %cst_38 [1] : vector<8x256xf32> to vector<8xf32>
    %114 = vector.shape_cast %113 : vector<8xf32> to vector<8x1xf32>
    %115 = arith.mulf %84, %84 : vector<8x256xf32>
    %cst_39 = arith.constant dense<0.000000e+00> : vector<8xf32>
    %116 = vector.multi_reduction <add>, %115, %cst_39 [1] : vector<8x256xf32> to vector<8xf32>
    %117 = vector.shape_cast %116 : vector<8xf32> to vector<8x1xf32>
    %cst_40 = arith.constant dense<0.000000e+00> : vector<8xf32>
    %118 = vector.multi_reduction <add>, %112, %cst_40 [1] : vector<8x256xf32> to vector<8xf32>
    %119 = vector.shape_cast %118 : vector<8xf32> to vector<8x1xf32>
    %120 = arith.mulf %112, %112 : vector<8x256xf32>
    %cst_41 = arith.constant dense<0.000000e+00> : vector<8xf32>
    %121 = vector.multi_reduction <add>, %120, %cst_41 [1] : vector<8x256xf32> to vector<8xf32>
    %122 = vector.shape_cast %121 : vector<8xf32> to vector<8x1xf32>
    %123 = arith.addf %114, %119 : vector<8x1xf32>
    %124 = arith.addf %117, %122 : vector<8x1xf32>
    %cst_42 = arith.constant 0.001953125 : f32
    %125 = vector.broadcast %cst_42 : f32 to vector<8x1xf32>
    %126 = arith.mulf %123, %125 : vector<8x1xf32>
    %cst_43 = arith.constant 0.001953125 : f32
    %127 = vector.broadcast %cst_43 : f32 to vector<8x1xf32>
    %128 = arith.mulf %124, %127 : vector<8x1xf32>
    %129 = arith.mulf %126, %126 : vector<8x1xf32>
    %130 = arith.subf %128, %129 : vector<8x1xf32>
    %c0_44 = arith.constant 0 : index
    %c0_45 = arith.constant 0 : index
    %131 = vector.load %arg7[%c0_44, %c0_45] : memref<8x1xf32, #tpu.memory_space<vmem>>, vector<8x1xf32>
    %cst_46 = arith.constant 9.99999974E-6 : f32
    %132 = vector.broadcast %cst_46 : f32 to vector<8x1xf32>
    %133 = arith.addf %130, %132 : vector<8x1xf32>
    %134 = math.rsqrt %133 : vector<8x1xf32>
    %135 = arith.mulf %131, %134 : vector<8x1xf32>
    %c0_47 = arith.constant 0 : index
    %c0_48 = arith.constant 0 : index
    %136 = vector.load %arg8[%c0_47, %c0_48] : memref<8x1xf32, #tpu.memory_space<vmem>>, vector<8x1xf32>
    %137 = arith.mulf %126, %135 : vector<8x1xf32>
    %138 = arith.subf %136, %137 : vector<8x1xf32>
    %139 = vector.broadcast %135 : vector<8x1xf32> to vector<8x256xf32>
    %140 = arith.mulf %84, %139 : vector<8x256xf32>
    %141 = vector.broadcast %138 : vector<8x1xf32> to vector<8x256xf32>
    %142 = arith.addf %140, %141 : vector<8x256xf32>
    %cst_49 = arith.constant 0.000000e+00 : f32
    %143 = vector.broadcast %cst_49 : f32 to vector<8x256xf32>
    %144 = arith.maximumf %142, %143 : vector<8x256xf32>
    %145 = arith.truncf %144 : vector<8x256xf32> to vector<8x256xbf16>
    %146 = vector.broadcast %135 : vector<8x1xf32> to vector<8x256xf32>
    %147 = arith.mulf %112, %146 : vector<8x256xf32>
    %148 = vector.broadcast %138 : vector<8x1xf32> to vector<8x256xf32>
    %149 = arith.addf %147, %148 : vector<8x256xf32>
    %cst_50 = arith.constant 0.000000e+00 : f32
    %150 = vector.broadcast %cst_50 : f32 to vector<8x256xf32>
    %151 = arith.maximumf %149, %150 : vector<8x256xf32>
    %152 = arith.truncf %151 : vector<8x256xf32> to vector<8x256xbf16>
    %c0_51 = arith.constant 0 : index
    %c0_52 = arith.constant 0 : index
    %153 = vector.load %arg3[%c0_51, %c0_52] : memref<32x8xbf16, #tpu.memory_space<vmem>>, vector<32x8xbf16>
    %cst_53 = arith.constant dense<0.000000e+00> : vector<32x256xf32>
    %154 = tpu.matmul %153, %145, %cst_53 {dimension_numbers = #tpu.dot_dimension_numbers<[1], [0], [0], [1], [0, 0, 1, 1], [], []>} : vector<32x8xbf16>, vector<8x256xbf16>, vector<32x256xf32> -> vector<32x256xf32>
    %c0_54 = arith.constant 0 : index
    %c0_55 = arith.constant 0 : index
    %155 = vector.load %arg3[%c0_54, %c0_55] : memref<32x8xbf16, #tpu.memory_space<vmem>>, vector<32x8xbf16>
    %cst_56 = arith.constant dense<0.000000e+00> : vector<32x256xf32>
    %156 = tpu.matmul %155, %152, %cst_56 {dimension_numbers = #tpu.dot_dimension_numbers<[1], [0], [0], [1], [0, 0, 1, 1], [], []>} : vector<32x8xbf16>, vector<8x256xbf16>, vector<32x256xf32> -> vector<32x256xf32>
    %cst_57 = arith.constant dense<0.000000e+00> : vector<32xf32>
    %157 = vector.multi_reduction <add>, %154, %cst_57 [1] : vector<32x256xf32> to vector<32xf32>
    %158 = vector.shape_cast %157 : vector<32xf32> to vector<32x1xf32>
    %159 = arith.mulf %154, %154 : vector<32x256xf32>
    %cst_58 = arith.constant dense<0.000000e+00> : vector<32xf32>
    %160 = vector.multi_reduction <add>, %159, %cst_58 [1] : vector<32x256xf32> to vector<32xf32>
    %161 = vector.shape_cast %160 : vector<32xf32> to vector<32x1xf32>
    %cst_59 = arith.constant dense<0.000000e+00> : vector<32xf32>
    %162 = vector.multi_reduction <add>, %156, %cst_59 [1] : vector<32x256xf32> to vector<32xf32>
    %163 = vector.shape_cast %162 : vector<32xf32> to vector<32x1xf32>
    %164 = arith.mulf %156, %156 : vector<32x256xf32>
    %cst_60 = arith.constant dense<0.000000e+00> : vector<32xf32>
    %165 = vector.multi_reduction <add>, %164, %cst_60 [1] : vector<32x256xf32> to vector<32xf32>
    %166 = vector.shape_cast %165 : vector<32xf32> to vector<32x1xf32>
    %167 = arith.addf %158, %163 : vector<32x1xf32>
    %168 = arith.addf %161, %166 : vector<32x1xf32>
    %cst_61 = arith.constant 0.001953125 : f32
    %169 = vector.broadcast %cst_61 : f32 to vector<32x1xf32>
    %170 = arith.mulf %167, %169 : vector<32x1xf32>
    %cst_62 = arith.constant 0.001953125 : f32
    %171 = vector.broadcast %cst_62 : f32 to vector<32x1xf32>
    %172 = arith.mulf %168, %171 : vector<32x1xf32>
    %173 = arith.mulf %170, %170 : vector<32x1xf32>
    %174 = arith.subf %172, %173 : vector<32x1xf32>
    %c0_63 = arith.constant 0 : index
    %c0_64 = arith.constant 0 : index
    %175 = vector.load %arg9[%c0_63, %c0_64] : memref<32x1xf32, #tpu.memory_space<vmem>>, vector<32x1xf32>
    %cst_65 = arith.constant 9.99999974E-6 : f32
    %176 = vector.broadcast %cst_65 : f32 to vector<32x1xf32>
    %177 = arith.addf %174, %176 : vector<32x1xf32>
    %178 = math.rsqrt %177 : vector<32x1xf32>
    %179 = arith.mulf %175, %178 : vector<32x1xf32>
    %c0_66 = arith.constant 0 : index
    %c0_67 = arith.constant 0 : index
    %180 = vector.load %arg10[%c0_66, %c0_67] : memref<32x1xf32, #tpu.memory_space<vmem>>, vector<32x1xf32>
    %181 = arith.mulf %170, %179 : vector<32x1xf32>
    %182 = arith.subf %180, %181 : vector<32x1xf32>
    %183 = vector.broadcast %179 : vector<32x1xf32> to vector<32x256xf32>
    %184 = arith.mulf %154, %183 : vector<32x256xf32>
    %185 = vector.broadcast %182 : vector<32x1xf32> to vector<32x256xf32>
    %186 = arith.addf %184, %185 : vector<32x256xf32>
    %187 = vector.broadcast %179 : vector<32x1xf32> to vector<32x256xf32>
    %188 = arith.mulf %156, %187 : vector<32x256xf32>
    %189 = vector.broadcast %182 : vector<32x1xf32> to vector<32x256xf32>
    %190 = arith.addf %188, %189 : vector<32x256xf32>
    %c0_68 = arith.constant 0 : index
    %c0_69 = arith.constant 0 : index
    %c0_70 = arith.constant 0 : index
    %191 = vector.load %arg0[%c0_68, %c0_69, %c0_70] : memref<2x32x256xf32, #tpu.memory_space<vmem>>, vector<1x32x256xf32>
    %192 = vector.shape_cast %191 : vector<1x32x256xf32> to vector<32x256xf32>
    %193 = arith.addf %186, %192 : vector<32x256xf32>
    %cst_71 = arith.constant 0.000000e+00 : f32
    %194 = vector.broadcast %cst_71 : f32 to vector<32x256xf32>
    %195 = arith.maximumf %193, %194 : vector<32x256xf32>
    %c0_72 = arith.constant 0 : index
    %c0_73 = arith.constant 0 : index
    %c0_74 = arith.constant 0 : index
    %196 = vector.load %arg11[%c0_72, %c0_73, %c0_74] : memref<2x32x256xf32, #tpu.memory_space<vmem>>, vector<1x32x256xf32>
    %197 = vector.shape_cast %196 : vector<1x32x256xf32> to vector<32x256xf32>
    %198 = vector.shape_cast %195 : vector<32x256xf32> to vector<1x32x256xf32>
    tpu.vector_store %arg11[%c0_72, %c0_73, %c0_74], %198 {strides = array<i32>} : memref<2x32x256xf32, #tpu.memory_space<vmem>>, vector<1x32x256xf32>,
    %c1_75 = arith.constant 1 : index
    %c0_76 = arith.constant 0 : index
    %c0_77 = arith.constant 0 : index
    %199 = vector.load %arg0[%c1_75, %c0_76, %c0_77] : memref<2x32x256xf32, #tpu.memory_space<vmem>>, vector<1x32x256xf32>
    %200 = vector.shape_cast %199 : vector<1x32x256xf32> to vector<32x256xf32>
    %201 = arith.addf %190, %200 : vector<32x256xf32>
    %cst_78 = arith.constant 0.000000e+00 : f32
    %202 = vector.broadcast %cst_78 : f32 to vector<32x256xf32>
    %203 = arith.maximumf %201, %202 : vector<32x256xf32>
    %c1_79 = arith.constant 1 : index
    %c0_80 = arith.constant 0 : index
    %c0_81 = arith.constant 0 : index
    %204 = vector.load %arg11[%c1_79, %c0_80, %c0_81] : memref<2x32x256xf32, #tpu.memory_space<vmem>>, vector<1x32x256xf32>
    %205 = vector.shape_cast %204 : vector<1x32x256xf32> to vector<32x256xf32>
    %206 = vector.shape_cast %203 : vector<32x256xf32> to vector<1x32x256xf32>
    tpu.vector_store %arg11[%c1_79, %c0_80, %c0_81], %206 {strides = array<i32>} : memref<2x32x256xf32, #tpu.memory_space<vmem>>, vector<1x32x256xf32>,
    return
  }
}

</mosaic_0001>

<bundles_post_ra>
// kernel: bottleneck_block_nchw.1
= control target key start
LH: loop header
LB: loop body
LE: loop exit
PB: predicated region body
PF: predicated region fallthrough
CT: control target
= control target key end

     0   :  { %v1044_v3 = vmov 0   ;;  %vm56_vm0 = vcmask 261120   ;;  %s1047_s16 = smov 113   ;;  %s1048_s17 = smov 127   ;;  %vm359_vm2 = vcmask 1043456   ;;  %vm355_vm10 = vcmask 588800   ;;  %s1576_s0 = inlined_call_operand.vmem [shape: f32[2,32,256], index: 0, kind: input, shape index: {}]   ;;  %s1577_s1 = inlined_call_operand.vmem [shape: bf16[8,32], index: 1, kind: input, shape index: {}]   ;;  %s1578_s5 = inlined_call_operand.vmem [shape: f32[8,1], index: 5, kind: input, shape index: {}]   ;;  %s1579_s6 = inlined_call_operand.vmem [shape: f32[8,1], index: 6, kind: input, shape index: {}]   ;;  %s1580_s4 = inlined_call_operand.vmem [shape: f32[9,256], index: 4, kind: input, shape index: {}]   ;;  %s1581_s2 = inlined_call_operand.vmem [shape: bf16[8,72], index: 2, kind: input, shape index: {}]   ;;  %s1582_s7 = inlined_call_operand.vmem [shape: f32[8,1], index: 7, kind: input, shape index: {}]   ;;  %s1583_s8 = inlined_call_operand.vmem [shape: f32[8,1], index: 8, kind: input, shape index: {}]   ;;  %s1584_s3 = inlined_call_operand.vmem [shape: bf16[32,8], index: 3, kind: input, shape index: {}]   ;;  %s1585_s9 = inlined_call_operand.vmem [shape: f32[32,1], index: 9, kind: input, shape index: {}]   ;;  %s1586_s10 = inlined_call_operand.vmem [shape: f32[32,1], index: 10, kind: input, shape index: {}]   ;;  %s1587_s11 = inlined_call_operand.vmem [shape: f32[2,32,256], index: 11, kind: output, shape index: {}]  }
   0x1   :  { %v49_v0 = vld [vmem:[%s1576_s0 + $0x28] sm:$0xff]  ;;  %v51_v1 = vld [vmem:[%s1576_s0 + $0x38] sm:$0xff]  ;;  %92 = vmatprep.mubr.bf16.mxu0 %v1044_v3  ;;  %146 = vmatprep.mubr.bf16.mxu1 %v1044_v3  ;;  %v48_v6 = vld [vmem:[%s1576_s0 + $0x20] sm:$0xff]  ;;  %s1049_s18 = smov 15   ;;  %s1050_s19 = smov 1   ;;  %vm597_vm11 = vcmask 64512  }
   0x2   :  { %v977_v2 = vld [vmem:[%s1576_s0 + $0x68] sm:$0xff]  ;;  %v55_v4 = vpack.c.bf16 %v51_v1, %v49_v0  ;;  %v979_v5 = vld [vmem:[%s1576_s0 + $0x78] sm:$0xff]  ;;  %v50_v7 = vld [vmem:[%s1576_s0 + $0x30] sm:$0xff]  ;;  %1020 = vset.pattern.permute.xlu0 %v1044_v3  ;;  %1021 = vset.pattern.permute.xlu1 %v1044_v3  ;;  %s1051_s20 = smov 17   ;;  %s1052_s21 = smov 16  }
   0x3   :  { %v113_v8 = vpack.c.bf16 %v979_v5, %v977_v2  ;;  %v54_v9 = vpack.c.bf16 %v50_v7, %v48_v6  ;;  %v976_v10 = vld [vmem:[%s1576_s0 + $0x60] sm:$0xff]  ;;  %v978_v11 = vld [vmem:[%s1576_s0 + $0x70] sm:$0xff]  ;;  %v45_v12 = vld [vmem:[%s1576_s0 + $0x8] sm:$0xff] }
   0x4   :  { %72 = vmatprep.subr.bf16.mxu0 %v55_v4  ;;  %v112_v13 = vpack.c.bf16 %v978_v11, %v976_v10  ;;  %v47_v14 = vld [vmem:[%s1576_s0 + $0x18] sm:$0xff]  ;;  %v973_v15 = vld [vmem:[%s1576_s0 + $0x48] sm:$0xff]  ;;  %v44_v19 = vld [vmem:[%s1576_s0] sm:$0xff]  ;;  %v210_v10 = vlaneseq }
   0x5   :  { %v975_v16 = vld [vmem:[%s1576_s0 + $0x58] sm:$0xff]  ;;  %126 = vmatprep.subr.bf16.mxu1 %v113_v8  ;;  %73 = vmatpush1.bf16.msra.mxu0 %v54_v9  ;;  %v53_v17 = vpack.c.bf16 %v47_v14, %v45_v12  ;;  %v46_v20 = vld [vmem:[%s1576_s0 + $0x10] sm:$0xff]  ;;  %v972_v21 = vld [vmem:[%s1576_s0 + $0x40] sm:$0xff] }
   0x6   :  { %v111_v18 = vpack.c.bf16 %v975_v16, %v973_v15  ;;  %127 = vmatpush1.bf16.msra.mxu1 %v112_v13  ;;  %v52_v22 = vpack.c.bf16 %v46_v20, %v44_v19  ;;  %v974_v23 = vld [vmem:[%s1576_s0 + $0x50] sm:$0xff]  ;;  %v43_v25 = vld [vmem:[%s1577_s1] sm:$0xf]  ;;  %v1216_v11 = vand.u32 127, %v210_v10  ;;  %v982_v15 = vld [vmem:[%s1580_s4 + $0x18] ss:$0 sm:$0xff] }
   0x7   :  { %74 = vmatprep.subr.bf16.mxu0 %v53_v17  ;;  %v110_v24 = vpack.c.bf16 %v974_v23, %v972_v21  ;;  %v177_v53 = vld [vmem:[%s1578_s5] sm:$0xff]  ;;  %s1045_s5 = smov 112   ;;  %v981_v14 = vld [vmem:[%s1580_s4 + $0x10] ss:$0 sm:$0xff] }
   0x8   :  { %128 = vmatprep.subr.bf16.mxu1 %v111_v18  ;;  %v181_v56 = vld [vmem:[%s1579_s6] sm:$0xff]  ;;  %s1046_s6 = smov 111   ;;  %vm331_vm1 = vcmp.lt.s32.totalorder %v1216_v11, 111  ;;  %vm297_vm3 = vcmp.lt.s32.totalorder %v1216_v11, 113  ;;  %vm314_vm4 = vcmp.lt.s32.totalorder %v1216_v11, 112  ;;  %vm280_vm5 = vcmp.lt.s32.totalorder %v1216_v11, 127 }
   0x9   :  { %75 = vmatpush1.bf16.msra.mxu0 %v52_v22  ;;  %vm246_vm6 = vcmp.lt.s32.totalorder %v1216_v11, 15  ;;  %vm263_vm7 = vcmp.lt.s32.totalorder %v1216_v11, 1  ;;  %vm212_vm8 = vcmp.lt.s32.totalorder %v1216_v11, 17  ;;  %vm229_vm9 = vcmp.lt.s32.totalorder %v1216_v11, 16 }
   0xa   :  { %129 = vmatpush1.bf16.msra.mxu1 %v110_v24 }
   0xc   :  { %971 = vmatmul.mubr.msk.bf16.vlgmr.msra.gmra.mxu0 %vm56_vm0, %v43_v25 }
   0xd   :  { %980 = vmatmul.mubr.msk.bf16.vlgmr.msra.gmra.mxu1 %vm56_vm0, %v43_v25  ;;  %398 = vmatprep.mubr.bf16.mxu0 %v1044_v3 }
   0xe   :  { %519 = vmatprep.mubr.bf16.mxu1 %v1044_v3 }
  0xcc   :  { %v94_v26 = vpop.f32.mrf.mxu0 }
  0xcd   :  { %v148_v27 = vpop.f32.mrf.mxu1  ;;  %v158_v31 = vmul.f32 %v94_v26, %v94_v26 }
  0xce   :  { %v96_v28 = vpop.f32.mrf.mxu0  ;;  %v166_v36 = vmul.f32 %v148_v27, %v148_v27 }
  0xcf   :  { %v150_v29 = vpop.f32.mrf.mxu1  ;;  %v155_v30 = vadd.f32 %v96_v28, %v94_v26  ;;  %v159_v32 = vmul.f32 %v96_v28, %v96_v28 }
  0xd0   :  { %v98_v33 = vpop.f32.mrf.mxu0  ;;  %v167_v37 = vmul.f32 %v150_v29, %v150_v29  ;;  %v163_v40 = vadd.f32 %v150_v29, %v148_v27 }
  0xd1   :  { %v152_v34 = vpop.f32.mrf.mxu1  ;;  %156 = vadd.xlane.f32.xlu0 %v155_v30  ;;  %v160_v35 = vadd.f32 %v159_v32, %v158_v31  ;;  %v1235_v30 = vshrl.u32 %v210_v10, 7 }
  0xd2   :  { %v99_v38 = vpop.f32.mrf.mxu0  ;;  %v168_v41 = vadd.f32 %v167_v37, %v166_v36  ;;  %v1241_v37 = vld [vmem:[%s1580_s4] sm:$0xff] }
  0xd3   :  { %v153_v39 = vpop.f32.mrf.mxu1  ;;  %161 = vadd.xlane.f32.xlu1 %v160_v35  ;;  %v302_v36 = vsub.s32 6, %v1235_v30 }
  0xd5   :  { %164 = vadd.xlane.f32.xlu0 %v163_v40  ;;  %v319_v40 = vsub.s32 7, %v1235_v30 }
  0xd7   :  { %169 = vadd.xlane.f32.xlu1 %v168_v41  ;;  %v1249_v41 = vld [vmem:[%s1580_s4 + $0x8] sm:$0xff] }
 0x15a   :  { %v157_v42 = vpop.xlane.xlu0 %156 }
 0x15c   :  { %v162_v43 = vpop.xlane.xlu1 %161 }
 0x15e   :  { %v165_v44 = vpop.xlane.xlu0 %164 }
 0x15f   :  { %v171_v45 = vadd.f32 %v165_v44, %v157_v42  ;;  %v307_v44 = vrot.slane %v1249_v41, %v302_v36 }
 0x160   :  { %v170_v46 = vpop.xlane.xlu1 %169 }
 0x161   :  { %v173_v47 = vmul.f32 0.001953125, %v171_v45  ;;  %v172_v48 = vadd.f32 %v170_v46, %v162_v43  ;;  %v303_v43 = vrot.slane %v1241_v37, %v302_v36  ;;  %v320_v45 = vrot.slane %v1241_v37, %v319_v40 }
 0x162   :  { %v324_v46 = vrot.slane %v1249_v41, %v319_v40 }
 0x163   :  { %v175_v49 = vmul.f32 %v173_v47, %v173_v47  ;;  %v174_v50 = vmul.f32 0.001953125, %v172_v48 }
 0x165   :  { %v176_v51 = vsub.f32 %v174_v50, %v175_v49 }
 0x167   :  { %v178_v52 = vadd.f32 1e-05, %v176_v51 }
 0x169   :  { %1024 = vrsqrt.f32 %v178_v52 }
 0x176   :  { %v1025_v54 = vpop.eup %1024 }
 0x177   :  { %v180_v55 = vmul.f32 %v1025_v54, %v177_v53 }
 0x179   :  { %186 = vperm.xlu0 %1020, %v180_v55   ;;  %v182_v57 = vmul.f32 %v180_v55, %v173_v47 }
 0x17b   :  { %v183_v58 = vsub.f32 %v181_v56, %v182_v57 }
 0x17d   :  { %193 = vperm.xlu1 %1021, %v183_v58  }
 0x1f4   :  { %v187_v59 = vpop.permute.xlu0 %186 }
 0x1f5   :  { %v189_v60 = vmul.f32 %v187_v59, %v94_v26  ;;  %v190_v61 = vmul.f32 %v187_v59, %v96_v28  ;;  %v201_v63 = vmul.f32 %v187_v59, %v150_v29  ;;  %v200_v6 = vmul.f32 %v187_v59, %v148_v27 }
 0x1f8   :  { %v194_v62 = vpop.permute.xlu1 %193 }
 0x1f9   :  { %v196_v0 = vadd.f32 %v194_v62, %v189_v60  ;;  %v197_v1 = vadd.f32 %v194_v62, %v190_v61  ;;  %v203_v5 = vadd.f32 %v201_v63, %v194_v62  ;;  %v202_v7 = vadd.f32 %v200_v6, %v194_v62 }
 0x1fa   :  { %v285_v60 = vsub.s32 5, %v1235_v30 }
 0x1fb   :  { %v1176_v2 = vmax.f32 %v196_v0, 0.0  ;;  %v1178_v4 = vmax.f32 %v197_v1, 0.0  ;;  %v1182_v8 = vmax.f32 %v203_v5, 0.0  ;;  %v1186_v9 = vmax.f32 %v202_v7, 0.0 }
 0x1fc   :  { %v286_v6 = vrot.slane %v1241_v37, %v285_v60  ;;  %v290_v7 = vrot.slane %v1249_v41, %v285_v60 }
 0x1fd   :  { %312 = vrot.lane.b32.xlu0 %v1178_v4, %s1045_s5  ;;  %327 = vrot.lane.b32.xlu1 %v1176_v2, %s1046_s6 }
 0x201   :  { %329 = vrot.lane.b32.xlu1 %v1178_v4, %s1046_s6  ;;  %449 = vrot.lane.b32.xlu0 %v1182_v8, %s1047_s16 }
 0x205   :  { %457 = vrot.lane.b32.xlu0 %v1182_v8, %s1045_s5  ;;  %463 = vrot.lane.b32.xlu1 %v1186_v9, %s1046_s6 }
 0x209   :  { %278 = vrot.lane.b32.xlu0 %v1178_v4, %s1048_s17  ;;  %465 = vrot.lane.b32.xlu1 %v1182_v8, %s1046_s6 }
 0x20d   :  { %441 = vrot.lane.b32.xlu0 %v1182_v8, %s1048_s17  ;;  %293 = vrot.lane.b32.xlu1 %v1176_v2, %s1047_s16 }
 0x211   :  { %244 = vrot.lane.b32.xlu0 %v1178_v4, %s1049_s18  ;;  %295 = vrot.lane.b32.xlu1 %v1178_v4, %s1047_s16 }
 0x215   :  { %261 = vrot.lane.b32.xlu0 %v1178_v4, %s1050_s19  ;;  %310 = vrot.lane.b32.xlu1 %v1176_v2, %s1045_s5 }
 0x219   :  { %425 = vrot.lane.b32.xlu0 %v1182_v8, %s1049_s18  ;;  %447 = vrot.lane.b32.xlu1 %v1186_v9, %s1047_s16 }
 0x21d   :  { %433 = vrot.lane.b32.xlu0 %v1182_v8, %s1050_s19  ;;  %455 = vrot.lane.b32.xlu1 %v1186_v9, %s1045_s5 }
 0x221   :  { %208 = vrot.lane.b32.xlu0 %v1178_v4, %s1051_s20  ;;  %276 = vrot.lane.b32.xlu1 %v1176_v2, %s1048_s17 }
 0x225   :  { %227 = vrot.lane.b32.xlu0 %v1178_v4, %s1052_s21  ;;  %439 = vrot.lane.b32.xlu1 %v1186_v9, %s1048_s17 }
 0x229   :  { %409 = vrot.lane.b32.xlu0 %v1182_v8, %s1051_s20  ;;  %242 = vrot.lane.b32.xlu1 %v1176_v2, %s1049_s18 }
 0x22d   :  { %417 = vrot.lane.b32.xlu0 %v1182_v8, %s1052_s21  ;;  %259 = vrot.lane.b32.xlu1 %v1176_v2, %s1050_s19 }
 0x231   :  { %423 = vrot.lane.b32.xlu1 %v1186_v9, %s1049_s18 }
 0x235   :  { %431 = vrot.lane.b32.xlu1 %v1186_v9, %s1050_s19 }
 0x239   :  { %206 = vrot.lane.b32.xlu1 %v1176_v2, %s1051_s20 }
 0x23d   :  { %225 = vrot.lane.b32.xlu1 %v1176_v2, %s1052_s21 }
 0x241   :  { %407 = vrot.lane.b32.xlu1 %v1186_v9, %s1051_s20 }
 0x245   :  { %415 = vrot.lane.b32.xlu1 %v1186_v9, %s1052_s21 }
 0x26f   :  { %v313_v12 = vpop.permute.xlu0 %312  ;;  %v328_v13 = vpop.permute.xlu1 %327 }
 0x273   :  { %v330_v16 = vpop.permute.xlu1 %329  ;;  %v450_v21 = vpop.permute.xlu0 %449 }
 0x274   :  { %v332_v17 = vsel %vm331_vm1, %v328_v13, %v330_v16  ;;  %v333_v18 = vsel %vm331_vm1, %v330_v16, %v328_v13 }
 0x275   :  { %v342_v19 = vmul.f32 %v981_v14, %v332_v17  ;;  %v343_v20 = vmul.f32 %v982_v15, %v333_v18 }
 0x277   :  { %v353_v22 = vpack.c.bf16 %v342_v19, %v342_v19  ;;  %v354_v23 = vpack.c.bf16 %v343_v20, %v343_v20  ;;  %v464_v24 = vpop.permute.xlu1 %463  ;;  %v458_v26 = vpop.permute.xlu0 %457 }
 0x279   :  { %983 = vmatprep.subr.msk.bf16.mxu0 %vm359_vm2, %v354_v23  ;;  %v361_v25 = vsel %vm359_vm2, %v353_v22, 0 }
 0x27a   :  { %373 = vmatpush1.bf16.msra.mxu0 %v361_v25 }
 0x27b   :  { %v466_v27 = vpop.permute.xlu1 %465  ;;  %v279_v38 = vpop.permute.xlu0 %278 }
 0x27c   :  { %v467_v28 = vsel %vm331_vm1, %v464_v24, %v466_v27  ;;  %v468_v29 = vsel %vm331_vm1, %v466_v27, %v464_v24 }
 0x27d   :  { %v469_v31 = vmul.f32 %v981_v14, %v467_v28  ;;  %v470_v32 = vmul.f32 %v982_v15, %v468_v29  ;;  %v251_v28 = vsub.s32 2, %v1235_v30 }
 0x27f   :  { %v479_v33 = vpack.c.bf16 %v469_v31, %v469_v31  ;;  %v480_v34 = vpack.c.bf16 %v470_v32, %v470_v32  ;;  %v294_v35 = vpop.permute.xlu1 %293  ;;  %v442_v49 = vpop.permute.xlu0 %441  ;;  %v256_v36 = vrot.slane %v1249_v41, %v251_v28 }
 0x281   :  { %985 = vmatprep.subr.msk.bf16.mxu1 %vm359_vm2, %v480_v34  ;;  %v482_v39 = vsel %vm359_vm2, %v479_v33, 0  ;;  %v268_v33 = vsub.s32 3, %v1235_v30 }
 0x282   :  { %494 = vmatpush1.bf16.msra.mxu1 %v482_v39 }
 0x283   :  { %v296_v42 = vpop.permute.xlu1 %295  ;;  %v245_v61 = vpop.permute.xlu0 %244  ;;  %v273_v39 = vrot.slane %v1249_v41, %v268_v33 }
 0x284   :  { %v298_v47 = vsel %vm297_vm3, %v294_v35, %v296_v42  ;;  %v299_v48 = vsel %vm297_vm3, %v296_v42, %v294_v35  ;;  %v252_v35 = vrot.slane %v1241_v37, %v251_v28 }
 0x285   :  { %v308_v53 = vmul.f32 %v303_v43, %v298_v47  ;;  %v309_v54 = vmul.f32 %v307_v44, %v299_v48 }
 0x287   :  { %v311_v50 = vpop.permute.xlu1 %310  ;;  %v262_v15 = vpop.permute.xlu0 %261 }
 0x288   :  { %v315_v51 = vsel %vm314_vm4, %v311_v50, %v313_v12  ;;  %v316_v52 = vsel %vm314_vm4, %v313_v12, %v311_v50 }
 0x289   :  { %v325_v55 = vmul.f32 %v320_v45, %v315_v51  ;;  %v326_v56 = vmul.f32 %v324_v46, %v316_v52 }
 0x28b   :  { %v351_v57 = vpack.c.bf16 %v325_v55, %v308_v53  ;;  %v448_v58 = vpop.permute.xlu1 %447  ;;  %v352_v59 = vpack.c.bf16 %v326_v56, %v309_v54  ;;  %v426_v29 = vpop.permute.xlu0 %425 }
 0x28c   :  { %v451_v62 = vsel %vm297_vm3, %v448_v58, %v450_v21  ;;  %v452_v63 = vsel %vm297_vm3, %v450_v21, %v448_v58  ;;  %v217_v58 = vsub.s32 0, %v1235_v30 }
 0x28d   :  { %374 = vmatprep.subr.bf16.mxu0 %v352_v59  ;;  %v453_v10 = vmul.f32 %v451_v62, %v303_v43  ;;  %v454_v12 = vmul.f32 %v452_v63, %v307_v44  ;;  %v234_v59 = vsub.s32 1, %v1235_v30 }
 0x28e   :  { %375 = vmatpush1.bf16.msra.mxu0 %v351_v57 }
 0x28f   :  { %v456_v0 = vpop.permute.xlu1 %455  ;;  %v434_v42 = vpop.permute.xlu0 %433  ;;  %v239_v30 = vrot.slane %v1249_v41, %v234_v59 }
 0x290   :  { %v459_v1 = vsel %vm314_vm4, %v456_v0, %v458_v26  ;;  %v460_v5 = vsel %vm314_vm4, %v458_v26, %v456_v0 }
 0x291   :  { %v461_v13 = vmul.f32 %v459_v1, %v320_v45  ;;  %v462_v14 = vmul.f32 %v460_v5, %v324_v46 }
 0x293   :  { %v477_v16 = vpack.c.bf16 %v461_v13, %v453_v10  ;;  %v277_v17 = vpop.permute.xlu1 %276  ;;  %v478_v18 = vpack.c.bf16 %v462_v14, %v454_v12  ;;  %v209_v52 = vpop.permute.xlu0 %208  ;;  %v222_v10 = vrot.slane %v1249_v41, %v217_v58  ;;  %v235_v12 = vrot.slane %v1241_v37, %v234_v59 }
 0x294   :  { %v281_v19 = vsel %vm280_vm5, %v277_v17, %v279_v38  ;;  %v282_v20 = vsel %vm280_vm5, %v279_v38, %v277_v17  ;;  %v269_v38 = vrot.slane %v1241_v37, %v268_v33 }
 0x295   :  { %v291_v21 = vmul.f32 %v286_v6, %v281_v19  ;;  %v292_v22 = vmul.f32 %v290_v7, %v282_v20  ;;  %495 = vmatprep.subr.bf16.mxu1 %v478_v18 }
 0x296   :  { %496 = vmatpush1.bf16.msra.mxu1 %v477_v16 }
 0x297   :  { %v349_v23 = vpack.c.bf16 %v291_v21, %v1176_v2  ;;  %v440_v24 = vpop.permute.xlu1 %439  ;;  %v350_v25 = vpack.c.bf16 %v292_v22, %v1178_v4  ;;  %v228_v0 = vpop.permute.xlu0 %227 }
 0x298   :  { %v443_v26 = vsel %vm280_vm5, %v440_v24, %v442_v49  ;;  %v444_v27 = vsel %vm280_vm5, %v442_v49, %v440_v24 }
 0x299   :  { %v445_v31 = vmul.f32 %v443_v26, %v286_v6  ;;  %v446_v32 = vmul.f32 %v444_v27, %v290_v7  ;;  %376 = vmatprep.subr.bf16.mxu0 %v350_v25  ;;  %v218_v7 = vrot.slane %v1241_v37, %v217_v58  ;;  %v344_v26 = vld [vmem:[%s1581_s2] sm:$0xf] }
 0x29a   :  { %377 = vmatpush1.bf16.msra.mxu0 %v349_v23 }
 0x29b   :  { %v475_v2 = vpack.c.bf16 %v445_v31, %v1186_v9  ;;  %v243_v4 = vpop.permute.xlu1 %242  ;;  %v476_v34 = vpack.c.bf16 %v446_v32, %v1182_v8  ;;  %v410_v18 = vpop.permute.xlu0 %409 }
 0x29c   :  { %v247_v40 = vsel %vm246_vm6, %v243_v4, %v245_v61  ;;  %v248_v9 = vsel %vm246_vm6, %v245_v61, %v243_v4 }
 0x29d   :  { %497 = vmatprep.subr.bf16.mxu1 %v476_v34  ;;  %v257_v45 = vmul.f32 %v252_v35, %v248_v9  ;;  %v258_v46 = vmul.f32 %v256_v36, %v247_v40 }
 0x29e   :  { %498 = vmatpush1.bf16.msra.mxu1 %v475_v2 }
 0x29f   :  { %v260_v8 = vpop.permute.xlu1 %259  ;;  %v418_v27 = vpop.permute.xlu0 %417 }
 0x2a0   :  { %v264_v43 = vsel %vm263_vm7, %v260_v8, %v262_v15  ;;  %v265_v44 = vsel %vm263_vm7, %v262_v15, %v260_v8 }
 0x2a1   :  { %v274_v47 = vmul.f32 %v269_v38, %v265_v44  ;;  %v275_v48 = vmul.f32 %v273_v39, %v264_v43 }
 0x2a3   :  { %v347_v49 = vpack.c.bf16 %v274_v47, %v257_v45  ;;  %v424_v50 = vpop.permute.xlu1 %423  ;;  %v348_v51 = vpack.c.bf16 %v275_v48, %v258_v46 }
 0x2a4   :  { %v427_v53 = vsel %vm246_vm6, %v424_v50, %v426_v29  ;;  %v428_v54 = vsel %vm246_vm6, %v426_v29, %v424_v50 }
 0x2a5   :  { %378 = vmatprep.subr.bf16.mxu0 %v348_v51  ;;  %v429_v60 = vmul.f32 %v428_v54, %v252_v35  ;;  %v430_v61 = vmul.f32 %v427_v53, %v256_v36 }
 0x2a6   :  { %379 = vmatpush1.bf16.msra.mxu0 %v347_v49 }
 0x2a7   :  { %v432_v55 = vpop.permute.xlu1 %431 }
 0x2a8   :  { %v435_v56 = vsel %vm263_vm7, %v432_v55, %v434_v42  ;;  %v436_v57 = vsel %vm263_vm7, %v434_v42, %v432_v55 }
 0x2a9   :  { %v437_v62 = vmul.f32 %v436_v57, %v269_v38  ;;  %v438_v63 = vmul.f32 %v435_v56, %v273_v39 }
 0x2ab   :  { %v473_v1 = vpack.c.bf16 %v437_v62, %v429_v60  ;;  %v207_v5 = vpop.permute.xlu1 %206  ;;  %v474_v6 = vpack.c.bf16 %v438_v63, %v430_v61  ;;  %v550_v62 = vld [vmem:[%s1582_s7] sm:$0xff] }
 0x2ac   :  { %v213_v13 = vsel %vm212_vm8, %v207_v5, %v209_v52  ;;  %v214_v14 = vsel %vm212_vm8, %v209_v52, %v207_v5 }
 0x2ad   :  { %499 = vmatprep.subr.bf16.mxu1 %v474_v6  ;;  %v223_v19 = vmul.f32 %v218_v7, %v214_v14  ;;  %v224_v20 = vmul.f32 %v222_v10, %v213_v13 }
 0x2ae   :  { %500 = vmatpush1.bf16.msra.mxu1 %v473_v1  ;;  %v554_v1 = vld [vmem:[%s1583_s8] sm:$0xff] }
 0x2af   :  { %v226_v15 = vpop.permute.xlu1 %225 }
 0x2b0   :  { %v230_v16 = vsel %vm229_vm9, %v226_v15, %v228_v0  ;;  %v231_v17 = vsel %vm229_vm9, %v228_v0, %v226_v15 }
 0x2b1   :  { %v240_v37 = vmul.f32 %v235_v12, %v231_v17  ;;  %v241_v21 = vmul.f32 %v239_v30, %v230_v16 }
 0x2b3   :  { %v345_v41 = vpack.c.bf16 %v240_v37, %v223_v19  ;;  %v408_v22 = vpop.permute.xlu1 %407  ;;  %v346_v23 = vpack.c.bf16 %v241_v21, %v224_v20 }
 0x2b4   :  { %v411_v24 = vsel %vm212_vm8, %v408_v22, %v410_v18  ;;  %v412_v25 = vsel %vm212_vm8, %v410_v18, %v408_v22 }
 0x2b5   :  { %380 = vmatprep.subr.bf16.mxu0 %v346_v23  ;;  %v413_v32 = vmul.f32 %v412_v25, %v218_v7  ;;  %v414_v33 = vmul.f32 %v411_v24, %v222_v10 }
 0x2b6   :  { %381 = vmatpush1.bf16.msra.mxu0 %v345_v41 }
 0x2b7   :  { %v416_v28 = vpop.permute.xlu1 %415 }
 0x2b8   :  { %v419_v29 = vsel %vm229_vm9, %v416_v28, %v418_v27  ;;  %v420_v31 = vsel %vm229_vm9, %v418_v27, %v416_v28  ;;  %v1022_v27 = vld [vmem:[%s1584_s3] sm:$0xff]   ;;  %v1023_v28 = vld [vmem:[%s1584_s3 + $0x8] sm:$0xff]  }
 0x2b9   :  { %v421_v2 = vmul.f32 %v420_v31, %v235_v12  ;;  %v422_v4 = vmul.f32 %v419_v29, %v239_v30  ;;  %984 = vmatmul.mubr.msk.bf16.vlgmr.msra.gmra.mxu0 %vm355_vm10, %v344_v26 }
 0x2ba   :  { %642 = vmatprep.mubr.bf16.mxu0 %v1044_v3 }
 0x2bb   :  { %v471_v34 = vpack.c.bf16 %v421_v2, %v413_v32  ;;  %v472_v35 = vpack.c.bf16 %v422_v4, %v414_v33 }
 0x2bd   :  { %501 = vmatprep.subr.bf16.mxu1 %v472_v35 }
 0x2be   :  { %502 = vmatpush1.bf16.msra.mxu1 %v471_v34 }
 0x2c1   :  { %986 = vmatmul.mubr.msk.bf16.vlgmr.msra.gmra.mxu1 %vm355_vm10, %v344_v26 }
 0x2c2   :  { %701 = vmatprep.mubr.bf16.mxu1 %v1044_v3 }
 0x379   :  { %v400_v36 = vpop.f32.mrf.mxu0 }
 0x37a   :  { %v531_v8 = vmul.f32 %v400_v36, %v400_v36 }
 0x37b   :  { %v402_v38 = vpop.f32.mrf.mxu0 }
 0x37c   :  { %v528_v39 = vadd.f32 %v402_v38, %v400_v36  ;;  %v532_v46 = vmul.f32 %v402_v38, %v402_v38 }
 0x37d   :  { %v404_v40 = vpop.f32.mrf.mxu0 }
 0x37e   :  { %529 = vadd.xlane.f32.xlu1 %v528_v39  ;;  %v533_v50 = vadd.f32 %v532_v46, %v531_v8 }
 0x37f   :  { %v405_v11 = vpop.f32.mrf.mxu0 }
 0x381   :  { %v521_v9 = vpop.f32.mrf.mxu1 }
 0x382   :  { %v539_v44 = vmul.f32 %v521_v9, %v521_v9 }
 0x383   :  { %v523_v42 = vpop.f32.mrf.mxu1 }
 0x384   :  { %v536_v43 = vadd.f32 %v523_v42, %v521_v9  ;;  %v540_v45 = vmul.f32 %v523_v42, %v523_v42 }
 0x385   :  { %v525_v47 = vpop.f32.mrf.mxu1 }
 0x386   :  { %537 = vadd.xlane.f32.xlu0 %v536_v43  ;;  %v541_v48 = vadd.f32 %v540_v45, %v539_v44 }
 0x387   :  { %v526_v49 = vpop.f32.mrf.mxu1 }
 0x388   :  { %542 = vadd.xlane.f32.xlu1 %v541_v48 }
 0x38a   :  { %534 = vadd.xlane.f32.xlu0 %v533_v50 }
 0x407   :  { %v530_v51 = vpop.xlane.xlu1 %529 }
 0x40f   :  { %v538_v52 = vpop.xlane.xlu0 %537 }
 0x410   :  { %v544_v53 = vadd.f32 %v538_v52, %v530_v51 }
 0x411   :  { %v543_v55 = vpop.xlane.xlu1 %542 }
 0x412   :  { %v546_v54 = vmul.f32 0.001953125, %v544_v53 }
 0x413   :  { %v535_v56 = vpop.xlane.xlu0 %534 }
 0x414   :  { %v545_v57 = vadd.f32 %v543_v55, %v535_v56  ;;  %v548_v58 = vmul.f32 %v546_v54, %v546_v54 }
 0x416   :  { %v547_v59 = vmul.f32 0.001953125, %v545_v57 }
 0x418   :  { %v549_v60 = vsub.f32 %v547_v59, %v548_v58 }
 0x41a   :  { %v551_v61 = vadd.f32 1e-05, %v549_v60 }
 0x41c   :  { %1026 = vrsqrt.f32 %v551_v61 }
 0x429   :  { %v1027_v63 = vpop.eup %1026 }
 0x42a   :  { %v553_v0 = vmul.f32 %v1027_v63, %v550_v62 }
 0x42c   :  { %559 = vperm.xlu0 %1020, %v553_v0   ;;  %v555_v5 = vmul.f32 %v553_v0, %v546_v54 }
 0x42e   :  { %v556_v6 = vsub.f32 %v554_v1, %v555_v5 }
 0x430   :  { %566 = vperm.xlu1 %1021, %v556_v6  }
 0x4a7   :  { %v560_v7 = vpop.permute.xlu0 %559 }
 0x4a8   :  { %v562_v10 = vmul.f32 %v560_v7, %v400_v36  ;;  %v563_v12 = vmul.f32 %v560_v7, %v402_v38  ;;  %v575_v30 = vmul.f32 %v560_v7, %v521_v9  ;;  %v576_v13 = vmul.f32 %v560_v7, %v523_v42 }
 0x4ab   :  { %v567_v14 = vpop.permute.xlu1 %566 }
 0x4ac   :  { %v569_v15 = vadd.f32 %v567_v14, %v562_v10  ;;  %v570_v16 = vadd.f32 %v567_v14, %v563_v12  ;;  %v577_v17 = vadd.f32 %v575_v30, %v567_v14  ;;  %v578_v18 = vadd.f32 %v576_v13, %v567_v14 }
 0x4ae   :  { %v572_v19 = vmax.f32 %v570_v16, 0.0  ;;  %v580_v20 = vmax.f32 %v578_v18, 0.0  ;;  %v571_v37 = vmax.f32 %v569_v15, 0.0  ;;  %v579_v21 = vmax.f32 %v577_v17, 0.0 }
 0x4b0   :  { %v574_v41 = vpack.c.bf16 %v572_v19, %v572_v19  ;;  %v582_v22 = vpack.c.bf16 %v580_v20, %v580_v20  ;;  %v573_v23 = vpack.c.bf16 %v571_v37, %v571_v37  ;;  %v581_v24 = vpack.c.bf16 %v579_v21, %v579_v21 }
 0x4b2   :  { %989 = vmatprep.subr.msk.bf16.mxu0 %vm359_vm2, %v574_v41  ;;  %992 = vmatprep.subr.msk.bf16.mxu1 %vm359_vm2, %v582_v22  ;;  %v605_v25 = vsel %vm359_vm2, %v573_v23, 0  ;;  %v664_v26 = vsel %vm359_vm2, %v581_v24, 0 }
 0x4b3   :  { %625 = vmatpush1.bf16.msra.mxu0 %v605_v25  ;;  %684 = vmatpush1.bf16.msra.mxu1 %v664_v26 }
 0x4b6   :  { %990 = vmatmul.mubr.msk.bf16.vlgmr.msra.gmra.mxu0 %vm597_vm11, %v1022_v27  ;;  %993 = vmatmul.mubr.msk.bf16.vlgmr.msra.gmra.mxu1 %vm597_vm11, %v1022_v27 }
 0x4b7   :  { %652 = vmatprep.mubr.bf16.mxu0 %v1044_v3  ;;  %711 = vmatprep.mubr.bf16.mxu1 %v1044_v3 }
 0x4be   :  { %991 = vmatmul.mubr.msk.bf16.gmra.mxu0 %vm597_vm11, %v1023_v28  ;;  %994 = vmatmul.mubr.msk.bf16.gmra.mxu1 %vm597_vm11, %v1023_v28 }
 0x576   :  { %v1360_v29 = vpop.f32.mrf.mxu0  ;;  %v1362_v31 = vpop.f32.mrf.mxu1 }
 0x577   :  { %v734_v36 = vmul.f32 %v1360_v29, %v1360_v29  ;;  %v766_v44 = vmul.f32 %v1362_v31, %v1362_v31 }
 0x578   :  { %v1364_v32 = vpop.f32.mrf.mxu0  ;;  %v1366_v33 = vpop.f32.mrf.mxu1 }
 0x579   :  { %v754_v2 = vadd.f32 %v1366_v33, %v1362_v31  ;;  %v722_v3 = vadd.f32 %v1364_v32, %v1360_v29  ;;  %v735_v4 = vmul.f32 %v1364_v32, %v1364_v32  ;;  %v767_v9 = vmul.f32 %v1366_v33, %v1366_v33 }
 0x57a   :  { %v1374_v34 = vpop.f32.mrf.mxu0  ;;  %v1376_v35 = vpop.f32.mrf.mxu1 }
 0x57b   :  { %755 = vadd.xlane.f32.xlu0 %v754_v2  ;;  %723 = vadd.xlane.f32.xlu1 %v722_v3  ;;  %v742_v40 = vadd.f32 %v735_v4, %v734_v36  ;;  %v736_v45 = vmul.f32 %v1374_v34, %v1374_v34  ;;  %v774_v47 = vadd.f32 %v767_v9, %v766_v44 }
 0x57c   :  { %v1380_v38 = vpop.f32.mrf.mxu0  ;;  %v1382_v39 = vpop.f32.mrf.mxu1  ;;  %v768_v52 = vmul.f32 %v1376_v35, %v1376_v35 }
 0x57d   :  { %v757_v11 = vadd.f32 %v1382_v39, %v1376_v35  ;;  %v737_v42 = vmul.f32 %v1380_v38, %v1380_v38  ;;  %v769_v49 = vmul.f32 %v1382_v39, %v1382_v39  ;;  %v725_v54 = vadd.f32 %v1380_v38, %v1374_v34 }
 0x57e   :  { %v1390_v8 = vpop.f32.mrf.mxu0  ;;  %v1392_v43 = vpop.f32.mrf.mxu1 }
 0x57f   :  { %743 = vadd.xlane.f32.xlu0 %v742_v40  ;;  %758 = vadd.xlane.f32.xlu1 %v757_v11  ;;  %v745_v48 = vadd.f32 %v737_v42, %v736_v45  ;;  %v777_v53 = vadd.f32 %v769_v49, %v768_v52  ;;  %v738_v60 = vmul.f32 %v1390_v8, %v1390_v8 }
 0x580   :  { %v1398_v46 = vpop.f32.mrf.mxu0  ;;  %v1404_v51 = vpop.f32.mrf.mxu1  ;;  %v770_v5 = vmul.f32 %v1392_v43, %v1392_v43 }
 0x581   :  { %v728_v57 = vadd.f32 %v1398_v46, %v1390_v8  ;;  %v760_v62 = vadd.f32 %v1404_v51, %v1392_v43  ;;  %v739_v0 = vmul.f32 %v1398_v46, %v1398_v46  ;;  %v771_v6 = vmul.f32 %v1404_v51, %v1404_v51 }
 0x582   :  { %v1402_v50 = vpop.f32.mrf.mxu0  ;;  %v1412_v56 = vpop.f32.mrf.mxu1 }
 0x583   :  { %775 = vadd.xlane.f32.xlu0 %v774_v47  ;;  %746 = vadd.xlane.f32.xlu1 %v745_v48  ;;  %v740_v1 = vmul.f32 %v1402_v50, %v1402_v50  ;;  %v748_v10 = vadd.f32 %v739_v0, %v738_v60  ;;  %v772_v30 = vmul.f32 %v1412_v56, %v1412_v56  ;;  %v810_v60 = vld [vmem:[%s1585_s9] sm:$0xff] }
 0x584   :  { %v1410_v55 = vpop.f32.mrf.mxu0  ;;  %v1418_v59 = vpop.f32.mrf.mxu1  ;;  %v780_v13 = vadd.f32 %v771_v6, %v770_v5 }
 0x585   :  { %v731_v58 = vadd.f32 %v1410_v55, %v1402_v50  ;;  %v741_v61 = vmul.f32 %v1410_v55, %v1410_v55  ;;  %v763_v63 = vadd.f32 %v1418_v59, %v1412_v56  ;;  %v773_v7 = vmul.f32 %v1418_v59, %v1418_v59 }
 0x587   :  { %778 = vadd.xlane.f32.xlu1 %v777_v53  ;;  %726 = vadd.xlane.f32.xlu0 %v725_v54  ;;  %v751_v12 = vadd.f32 %v741_v61, %v740_v1  ;;  %v783_v14 = vadd.f32 %v773_v7, %v772_v30  ;;  %v811_v30 = vld [vmem:[%s1585_s9 + $0x8] sm:$0xff] }
 0x58b   :  { %729 = vadd.xlane.f32.xlu0 %v728_v57  ;;  %732 = vadd.xlane.f32.xlu1 %v731_v58 }
 0x58f   :  { %761 = vadd.xlane.f32.xlu0 %v760_v62  ;;  %764 = vadd.xlane.f32.xlu1 %v763_v63 }
 0x593   :  { %749 = vadd.xlane.f32.xlu0 %v748_v10  ;;  %752 = vadd.xlane.f32.xlu1 %v751_v12 }
 0x597   :  { %781 = vadd.xlane.f32.xlu0 %v780_v13  ;;  %784 = vadd.xlane.f32.xlu1 %v783_v14 }
 0x604   :  { %v756_v15 = vpop.xlane.xlu0 %755  ;;  %v724_v16 = vpop.xlane.xlu1 %723 }
 0x605   :  { %v786_v17 = vadd.f32 %v756_v15, %v724_v16 }
 0x607   :  { %v794_v20 = vmul.f32 0.001953125, %v786_v17 }
 0x608   :  { %v744_v18 = vpop.xlane.xlu0 %743  ;;  %v759_v19 = vpop.xlane.xlu1 %758 }
 0x609   :  { %v802_v22 = vmul.f32 %v794_v20, %v794_v20 }
 0x60c   :  { %v776_v37 = vpop.xlane.xlu0 %775  ;;  %v747_v21 = vpop.xlane.xlu1 %746 }
 0x60d   :  { %v790_v41 = vadd.f32 %v776_v37, %v744_v18  ;;  %v827_v18 = vld [vmem:[%s1586_s10 + $0x8] sm:$0xff] }
 0x60f   :  { %v798_v23 = vmul.f32 0.001953125, %v790_v41 }
 0x610   :  { %v779_v24 = vpop.xlane.xlu1 %778  ;;  %v727_v25 = vpop.xlane.xlu0 %726 }
 0x611   :  { %v806_v26 = vsub.f32 %v798_v23, %v802_v22  ;;  %v791_v27 = vadd.f32 %v779_v24, %v747_v21  ;;  %v787_v28 = vadd.f32 %v759_v19, %v727_v25  ;;  %v826_v19 = vld [vmem:[%s1586_s10] sm:$0xff]  ;;  %v812_v22 = vld [vmem:[%s1585_s9 + $0x10] sm:$0xff] }
 0x613   :  { %v814_v2 = vadd.f32 1e-05, %v806_v26  ;;  %v795_v3 = vmul.f32 0.001953125, %v787_v28  ;;  %v799_v40 = vmul.f32 0.001953125, %v791_v27  ;;  %v828_v27 = vld [vmem:[%s1586_s10 + $0x10] sm:$0xff] }
 0x614   :  { %v730_v4 = vpop.xlane.xlu0 %729  ;;  %v733_v36 = vpop.xlane.xlu1 %732 }
 0x615   :  { %1028 = vrsqrt.f32 %v814_v2  ;;  %v803_v11 = vmul.f32 %v795_v3, %v795_v3  ;;  %v829_v2 = vld [vmem:[%s1586_s10 + $0x18] sm:$0xff] }
 0x617   :  { %v807_v9 = vsub.f32 %v799_v40, %v803_v11 }
 0x618   :  { %v762_v42 = vpop.xlane.xlu0 %761  ;;  %v765_v44 = vpop.xlane.xlu1 %764 }
 0x619   :  { %v815_v45 = vadd.f32 1e-05, %v807_v9  ;;  %v788_v47 = vadd.f32 %v762_v42, %v730_v4  ;;  %v789_v48 = vadd.f32 %v765_v44, %v733_v36 }
 0x61b   :  { %1030 = vrsqrt.f32 %v815_v45  ;;  %v796_v53 = vmul.f32 0.001953125, %v788_v47  ;;  %v797_v54 = vmul.f32 0.001953125, %v789_v48 }
 0x61c   :  { %v750_v49 = vpop.xlane.xlu0 %749  ;;  %v753_v52 = vpop.xlane.xlu1 %752 }
 0x61d   :  { %v804_v0 = vmul.f32 %v796_v53, %v796_v53  ;;  %v805_v1 = vmul.f32 %v797_v54, %v797_v54 }
 0x620   :  { %v782_v57 = vpop.xlane.xlu0 %781  ;;  %v785_v58 = vpop.xlane.xlu1 %784 }
 0x621   :  { %v792_v61 = vadd.f32 %v782_v57, %v750_v49  ;;  %v793_v62 = vadd.f32 %v785_v58, %v753_v52 }
 0x622   :  { %v1029_v63 = vpop.eup %1028 }
 0x623   :  { %v800_v5 = vmul.f32 0.001953125, %v792_v61  ;;  %v801_v6 = vmul.f32 0.001953125, %v793_v62  ;;  %v822_v7 = vmul.f32 %v1029_v63, %v810_v60  ;;  %v1036_v62 = vld [vmem:[%s1576_s0 + $0x10] sm:$0xff] }
 0x625   :  { %v808_v10 = vsub.f32 %v800_v5, %v804_v0  ;;  %v809_v12 = vsub.f32 %v801_v6, %v805_v1  ;;  %840 = vperm.xlu0 %1020, %v822_v7   ;;  %v830_v17 = vmul.f32 %v822_v7, %v794_v20  ;;  %v813_v20 = vld [vmem:[%s1585_s9 + $0x18] sm:$0xff]  ;;  %v1038_v7 = vld [vmem:[%s1576_s0] sm:$0xff] }
 0x626   :  { %v1037_v0 = vld [vmem:[%s1576_s0 + $0x18] sm:$0xff] }
 0x627   :  { %v816_v13 = vadd.f32 1e-05, %v808_v10  ;;  %v817_v14 = vadd.f32 1e-05, %v809_v12  ;;  %v834_v41 = vsub.f32 %v826_v19, %v830_v17  ;;  %v1039_v12 = vld [vmem:[%s1576_s0 + $0x8] sm:$0xff] }
 0x628   :  { %v1031_v15 = vpop.eup %1030 }
 0x629   :  { %v823_v16 = vmul.f32 %v1031_v15, %v811_v30  ;;  %1032 = vrsqrt.f32 %v816_v13 }
 0x62a   :  { %1034 = vrsqrt.f32 %v817_v14 }
 0x62b   :  { %v831_v37 = vmul.f32 %v823_v16, %v795_v3  ;;  %845 = vperm.xlu1 %1021, %v823_v16  }
 0x62d   :  { %v835_v21 = vsub.f32 %v827_v18, %v831_v37 }
 0x62f   :  { %873 = vperm.xlu0 %1020, %v835_v21   ;;  %868 = vperm.xlu1 %1021, %v834_v41  }
 0x636   :  { %v1033_v23 = vpop.eup %1032 }
 0x637   :  { %v1035_v24 = vpop.eup %1034  ;;  %v824_v25 = vmul.f32 %v1033_v23, %v812_v22 }
 0x638   :  { %v825_v26 = vmul.f32 %v1035_v24, %v813_v20 }
 0x639   :  { %850 = vperm.xlu1 %1021, %v824_v25   ;;  %v832_v28 = vmul.f32 %v824_v25, %v796_v53  ;;  %v997_v53 = vld [vmem:[%s1576_s0 + $0x50] sm:$0xff] }
 0x63a   :  { %855 = vperm.xlu0 %1020, %v825_v26   ;;  %v833_v3 = vmul.f32 %v825_v26, %v797_v54 }
 0x63b   :  { %v836_v4 = vsub.f32 %v828_v27, %v832_v28 }
 0x63c   :  { %v837_v36 = vsub.f32 %v829_v2, %v833_v3 }
 0x63d   :  { %878 = vperm.xlu1 %1021, %v836_v4   ;;  %v999_v4 = vld [vmem:[%s1576_s0 + $0x60] sm:$0xff] }
 0x63e   :  { %883 = vperm.xlu0 %1020, %v837_v36  }
 0x6a0   :  { %v841_v40 = vpop.permute.xlu0 %840 }
 0x6a1   :  { %v858_v47 = vmul.f32 %v841_v40, %v1360_v29  ;;  %v859_v48 = vmul.f32 %v841_v40, %v1364_v32  ;;  %v894_v49 = vmul.f32 %v841_v40, %v1362_v31  ;;  %v895_v52 = vmul.f32 %v841_v40, %v1366_v33  ;;  %v995_v31 = vld [vmem:[%s1576_s0 + $0x40] sm:$0xff]  ;;  %v996_v32 = vld [vmem:[%s1576_s0 + $0x48] sm:$0xff] }
 0x6a6   :  { %v846_v11 = vpop.permute.xlu1 %845 }
 0x6a7   :  { %v860_v9 = vmul.f32 %v846_v11, %v1374_v34  ;;  %v861_v42 = vmul.f32 %v846_v11, %v1380_v38  ;;  %v896_v44 = vmul.f32 %v846_v11, %v1376_v35  ;;  %v897_v45 = vmul.f32 %v846_v11, %v1382_v39  ;;  %v998_v34 = vld [vmem:[%s1576_s0 + $0x58] sm:$0xff] }
 0x6aa   :  { %v874_v38 = vpop.permute.xlu0 %873  ;;  %v869_v35 = vpop.permute.xlu1 %868 }
 0x6ab   :  { %v888_v54 = vadd.f32 %v874_v38, %v860_v9  ;;  %v889_v39 = vadd.f32 %v874_v38, %v861_v42  ;;  %v904_v57 = vadd.f32 %v896_v44, %v874_v38  ;;  %v905_v29 = vadd.f32 %v897_v45, %v874_v38  ;;  %v1040_v44 = vld [vmem:[%s1576_s0 + $0x20] sm:$0xff]  ;;  %v1043_v38 = vld [vmem:[%s1576_s0 + $0x38] sm:$0xff] }
 0x6ac   :  { %v886_v33 = vadd.f32 %v869_v35, %v858_v47  ;;  %v887_v58 = vadd.f32 %v869_v35, %v859_v48  ;;  %v902_v60 = vadd.f32 %v894_v49, %v869_v35  ;;  %v903_v61 = vadd.f32 %v895_v52, %v869_v35  ;;  %v1041_v47 = vld [vmem:[%s1576_s0 + $0x28] sm:$0xff] }
 0x6ad   :  { %v912_v63 = vadd.f32 %v1036_v62, %v888_v54  ;;  %v913_v1 = vadd.f32 %v1037_v0, %v889_v39  ;;  %v944_v5 = vadd.f32 %v997_v53, %v904_v57  ;;  %v945_v6 = vadd.f32 %v998_v34, %v905_v29  ;;  %v1042_v53 = vld [vmem:[%s1576_s0 + $0x30] sm:$0xff] }
 0x6ae   :  { %v910_v10 = vadd.f32 %v1038_v7, %v886_v33  ;;  %v911_v30 = vadd.f32 %v1039_v12, %v887_v58  ;;  %v942_v13 = vadd.f32 %v995_v31, %v902_v60  ;;  %v943_v14 = vadd.f32 %v996_v32, %v903_v61 }
 0x6af   :  { %v920_v15 = vmax.f32 %v912_v63, 0.0  ;;  %v921_v16 = vmax.f32 %v913_v1, 0.0  ;;  %v952_v17 = vmax.f32 %v944_v5, 0.0  ;;  %v953_v18 = vmax.f32 %v945_v6, 0.0 }
 0x6b0   :  { %v918_v19 = vmax.f32 %v910_v10, 0.0  ;;  %v919_v37 = vmax.f32 %v911_v30, 0.0  ;;  %v950_v21 = vmax.f32 %v942_v13, 0.0  ;;  %v951_v41 = vmax.f32 %v943_v14, 0.0 }
 0x6b1   :  { %928 = vst [vmem:[%s1587_s11 + $0x10] sm:$0xff] %v920_v15  ;;  %929 = vst [vmem:[%s1587_s11 + $0x18] sm:$0xff] %v921_v16 }
 0x6b2   :  { %1005 = vst [vmem:[%s1587_s11 + $0x50] sm:$0xff] %v952_v17  ;;  %1006 = vst [vmem:[%s1587_s11 + $0x58] sm:$0xff] %v953_v18 }
 0x6b3   :  { %926 = vst [vmem:[%s1587_s11] sm:$0xff] %v918_v19  ;;  %927 = vst [vmem:[%s1587_s11 + $0x8] sm:$0xff] %v919_v37 }
 0x6b4   :  { %1003 = vst [vmem:[%s1587_s11 + $0x40] sm:$0xff] %v950_v21  ;;  %1004 = vst [vmem:[%s1587_s11 + $0x48] sm:$0xff] %v951_v41  ;;  %v851_v22 = vpop.permute.xlu1 %850 }
 0x6b5   :  { %v856_v20 = vpop.permute.xlu0 %855  ;;  %v862_v23 = vmul.f32 %v851_v22, %v1390_v8  ;;  %v863_v24 = vmul.f32 %v851_v22, %v1398_v46  ;;  %v898_v25 = vmul.f32 %v851_v22, %v1392_v43  ;;  %v899_v26 = vmul.f32 %v851_v22, %v1404_v51  ;;  %v1000_v8 = vld [vmem:[%s1576_s0 + $0x68] sm:$0xff]  ;;  %v1001_v43 = vld [vmem:[%s1576_s0 + $0x70] sm:$0xff] }
 0x6b6   :  { %v864_v27 = vmul.f32 %v856_v20, %v1402_v50  ;;  %v865_v28 = vmul.f32 %v856_v20, %v1410_v55  ;;  %v900_v2 = vmul.f32 %v856_v20, %v1412_v56  ;;  %v901_v3 = vmul.f32 %v856_v20, %v1418_v59  ;;  %v1002_v50 = vld [vmem:[%s1576_s0 + $0x78] sm:$0xff] }
 0x6b8   :  { %v879_v46 = vpop.permute.xlu1 %878 }
 0x6b9   :  { %v884_v51 = vpop.permute.xlu0 %883  ;;  %v890_v55 = vadd.f32 %v879_v46, %v862_v23  ;;  %v891_v56 = vadd.f32 %v879_v46, %v863_v24  ;;  %v906_v59 = vadd.f32 %v898_v25, %v879_v46  ;;  %v907_v36 = vadd.f32 %v899_v26, %v879_v46 }
 0x6ba   :  { %v892_v40 = vadd.f32 %v884_v51, %v864_v27  ;;  %v893_v11 = vadd.f32 %v884_v51, %v865_v28  ;;  %v908_v9 = vadd.f32 %v900_v2, %v884_v51  ;;  %v909_v42 = vadd.f32 %v901_v3, %v884_v51 }
 0x6bb   :  { %v914_v45 = vadd.f32 %v1040_v44, %v890_v55  ;;  %v915_v48 = vadd.f32 %v1041_v47, %v891_v56  ;;  %v946_v49 = vadd.f32 %v999_v4, %v906_v59  ;;  %v947_v52 = vadd.f32 %v1000_v8, %v907_v36 }
 0x6bc   :  { %v916_v34 = vadd.f32 %v1042_v53, %v892_v40  ;;  %v917_v35 = vadd.f32 %v1043_v38, %v893_v11  ;;  %v948_v54 = vadd.f32 %v1001_v43, %v908_v9  ;;  %v949_v39 = vadd.f32 %v1002_v50, %v909_v42 }
 0x6bd   :  { %v922_v57 = vmax.f32 %v914_v45, 0.0  ;;  %v923_v29 = vmax.f32 %v915_v48, 0.0  ;;  %v954_v31 = vmax.f32 %v946_v49, 0.0  ;;  %v955_v32 = vmax.f32 %v947_v52, 0.0 }
 0x6be   :  { %v924_v33 = vmax.f32 %v916_v34, 0.0  ;;  %v925_v58 = vmax.f32 %v917_v35, 0.0  ;;  %v956_v60 = vmax.f32 %v948_v54, 0.0  ;;  %v957_v61 = vmax.f32 %v949_v39, 0.0 }
 0x6bf   :  { %930 = vst [vmem:[%s1587_s11 + $0x20] sm:$0xff] %v922_v57  ;;  %931 = vst [vmem:[%s1587_s11 + $0x28] sm:$0xff] %v923_v29 }
 0x6c0   :  { %1007 = vst [vmem:[%s1587_s11 + $0x60] sm:$0xff] %v954_v31  ;;  %1008 = vst [vmem:[%s1587_s11 + $0x68] sm:$0xff] %v955_v32 }
 0x6c1   :  { %932 = vst [vmem:[%s1587_s11 + $0x30] sm:$0xff] %v924_v33  ;;  %933 = vst [vmem:[%s1587_s11 + $0x38] sm:$0xff] %v925_v58 }
 0x6c2   :  { %1009 = vst [vmem:[%s1587_s11 + $0x70] sm:$0xff] %v956_v60  ;;  %1010 = vst [vmem:[%s1587_s11 + $0x78] sm:$0xff] %v957_v61 }

</bundles_post_ra>
